<compile_context>
chip_gen: v5e
topology: v5e:2x2
jax: 0.10.0
libtpu: 0.0.40
codegen_flags: <defaults>
</compile_context>

<pallas_src>
import jax
import jax.numpy as jnp
from jax.experimental import pallas as pl
from jax.experimental.pallas import tpu as pltpu

_NUM_LAYERS = 5
_FAMILY = 32
_PACK = 8  # pack 8 family_size=32 rows into one 256-lane row

_PARALLEL = getattr(pltpu, "PARALLEL", "parallel")
_CORE_PARALLEL = getattr(pltpu, "CORE_PARALLEL", _PARALLEL)


def _device_kind():
    try:
        return jax.devices()[0].device_kind.lower()
    except Exception:
        return ""


def _default_tile_packed_rows():
    # v7x: 3.2 TB/s HBM + 2 TCs -> 8 MiB f32 input tiles; v5e/v6e: 4 MiB.
    return 8192 if "v7" in _device_kind() else 4096


def _row_axis_semantics(grid_steps):
    # Only CORE_PARALLEL changes codegen: shard the row axis across v7x's two
    # TensorCores when there is enough work; harmless PARALLEL otherwise.
    if grid_steps >= 4 and "v7" in _device_kind():
        return (_CORE_PARALLEL,)
    return (_PARALLEL,)


def _coeff_refine_kernel(cp_ref, w_ref, b_ref, out_ref):
    # cp_ref : (TILE_P, 256)  lane-dense packed coefficients (native dtype)
    # w_ref  : (256, 40)      block-diagonal packed per-layer weights (f32)
    # b_ref  : (1, 40)        per-layer biases, tiled _PACK times (f32)
    # out_ref: (TILE_P, 40)   f32
    c = cp_ref[...].astype(jnp.float32)  # cast on the VPU; no extra HBM pass
    out_ref[...] = (
        jnp.dot(c, w_ref[...], preferred_element_type=jnp.float32) + b_ref[...]
    )


def _coeff_refine_pallas(coeff, w_packed, biases, tile_packed_rows):
    """coeff: (N8, F) native dtype with N8 % _PACK == 0 -> (N8, 5) f32."""
    N8, F = coeff.shape
    L = w_packed.shape[1]
    P = N8 // _PACK

    # Row-major reshape -> lane-dense (P, 256).  Pure bitcast, no data movement.
    packed = coeff.reshape(P, _PACK * F)

    # Block-diagonal weight: lane group j (32 lanes) feeds output columns
    # [5j, 5j+5), i.e. original row 8q + j.
    w_bd = jnp.zeros((_PACK * F, _PACK * L), jnp.float32)
    for j in range(_PACK):
        w_bd = w_bd.at[j * F:(j + 1) * F, j * L:(j + 1) * L].set(w_packed)
    b_bd = jnp.tile(biases, (1, _PACK))                                  # (1, 40)

    # Tile over packed rows; keep the sublane dim a multiple of 8 unless the
    # block covers the whole array.
    tile_p = min(int(tile_packed_rows), P)
    if tile_p != P:
        tile_p = max(8, (tile_p // 8) * 8)
    grid_steps = pl.cdiv(P, tile_p)

    in_bytes = packed.size * packed.dtype.itemsize
    out_bytes = P * _PACK * L * 4
    cost = pl.CostEstimate(
        flops=2 * P * (_PACK * F) * (_PACK * L),
        transcendentals=0,
        bytes_accessed=in_bytes + out_bytes + w_bd.size * 4,
    )

    out = pl.pallas_call(
        _coeff_refine_kernel,
        out_shape=jax.ShapeDtypeStruct((P, _PACK * L), jnp.float32),
        grid=(grid_steps,),
        in_specs=[
            pl.BlockSpec((tile_p, _PACK * F), lambda i: (i, 0)),
            pl.BlockSpec((_PACK * F, _PACK * L), lambda i: (0, 0)),
            pl.BlockSpec((1, _PACK * L), lambda i: (0, 0)),
        ],
        out_specs=pl.BlockSpec((tile_p, _PACK * L), lambda i: (i, 0)),
        compiler_params=pltpu.CompilerParams(
            dimension_semantics=_row_axis_semantics(grid_steps),
            # 48 MiB: plenty for 2x8 MiB in + 2x1.25 MiB out buffers, and
            # safely below v7x's 64 MiB physical VMEM (128 MiB on v5e/v6e).
            vmem_limit_bytes=48 * 1024 * 1024,
        ),
        cost_estimate=cost,
    )(packed, w_bd, b_bd)

    return out.reshape(N8, L)


def coefficient_refinement_forward(coefficients, initial_bias, x, y, W, *,
                                   tile_packed_rows=None,
                                   min_rows_for_pallas=262144,
                                   return_packed=True):
    """Replicates CoefficientRefinementNetwork.forward.

    coefficients: (N, F); initial_bias: scalar; x, y unused; W: (5, 1, F).
    Returns (coefficients, bias0, outputs).  By default `outputs` is the fused
    (N, 5) f32 slab (column i == layer i) -- preferred for performance since it
    avoids 5 strided output copies.  Pass return_packed=False for the
    torch-parity list of 5 (N, 1) arrays.
    Coefficients are read in their stored dtype and accumulated in f32.
    """
    del x, y  # unused by the reference forward pass
    N, F = coefficients.shape
    num_layers = W.shape[0]
    assert num_layers == _NUM_LAYERS and W.shape[1] == 1 and W.shape[2] == F

    w_packed = jnp.transpose(W[:, 0, :], (1, 0)).astype(jnp.float32)    # (F, 5)
    biases = jnp.zeros((1, num_layers), jnp.float32).at[0, 0].set(
        jnp.asarray(initial_bias, jnp.float32))                         # (1, 5)
    bias0 = jnp.asarray(initial_bias, jnp.float32)

    if tile_packed_rows is None:
        tile_packed_rows = _default_tile_packed_rows()

    n_main = (N // _PACK) * _PACK
    if N < min_rows_for_pallas or F != _FAMILY or n_main == 0:
        # Small problem (or non-packable F): a fused XLA matmul+add is free and
        # fuses with its neighbors; pallas_call launch cost would dominate.
        out = coefficients.astype(jnp.float32) @ w_packed + biases
    else:
        out_main = _coeff_refine_pallas(coefficients[:n_main], w_packed, biases,
                                        tile_packed_rows)
        if n_main < N:
            # <=7 leftover rows: plain jnp, no pad copy of the whole array.
            tail = coefficients[n_main:].astype(jnp.float32) @ w_packed + biases
            out = jnp.concatenate([out_main, tail], axis=0)
        else:
            out = out_main

    if return_packed:
        return coefficients, bias0, out
    outputs = [out[:, i:i + 1] for i in range(num_layers)]              # 5 x (N, 1)
    return coefficients, bias0, outputs


if __name__ == "__main__":
    key = jax.random.PRNGKey(0)
    k_coeff, k_bias, k_w, k_x, k_y = jax.random.split(key, 5)

    N = 2048          # small test size; Pallas path forced via min_rows_for_pallas=0
    family_size = 32

    initial_coefficients = jax.random.normal(k_coeff, (N, family_size), jnp.float32)
    initial_bias = jax.random.normal(k_bias, (), jnp.float32)
    W = jax.random.normal(k_w, (5, 1, family_size), jnp.float32)
    # x, y are unused by the forward pass; small placeholders for signature parity.
    x = jax.random.normal(k_x, (N, 2), jnp.float32)
    y = jax.random.normal(k_y, (N, 2), jnp.float32)

    # Small tile so the 1-D row grid (and its double-buffered pipeline) is
    # actually exercised: packed rows P = 2048/8 = 256, tile = 64 -> grid (4,).
    coeffs, bias0, packed_out = coefficient_refinement_forward(
        initial_coefficients, initial_bias, x, y, W,
        tile_packed_rows=64, min_rows_for_pallas=0)
    jax.block_until_ready((coeffs, bias0, packed_out))

    # Pure-JAX reference (same math as the torch module).
    ref = (initial_coefficients @ jnp.transpose(W[:, 0, :], (1, 0))
           + jnp.zeros((1, 5), jnp.float32).at[0, 0].set(initial_bias))
    assert packed_out.shape == (N, 5)
    assert jnp.allclose(packed_out, ref, atol=1e-4, rtol=1e-4), "mismatch vs reference"
    assert jnp.allclose(coeffs, initial_coefficients)
    assert jnp.allclose(bias0, initial_bias)

    # Torch-parity list output + ragged N (tail rows handled by jnp, no pad copy),
    # also exercises the partial last grid block (P = 255, tile = 64).
    N2 = 2045
    c2, b2, outs2 = coefficient_refinement_forward(
        initial_coefficients[:N2], initial_bias, x[:N2], y[:N2], W,
        tile_packed_rows=64, min_rows_for_pallas=0, return_packed=False)
    jax.block_until_ready(outs2)
    for i, got in enumerate(outs2):
        r = initial_coefficients[:N2] @ W[i, 0, :][:, None] + (initial_bias if i == 0 else 0.0)
        assert got.shape == (N2, 1)
        assert jnp.allclose(got, r, atol=1e-4, rtol=1e-4), "mismatch in ragged path"

    # Tiny-N fallback path (plain jnp, no kernel launch) under the default threshold.
    c3, b3, out3 = coefficient_refinement_forward(
        initial_coefficients[:8], initial_bias, x[:8], y[:8], W)
    jax.block_until_ready(out3)
    assert jnp.allclose(out3, ref[:8], atol=1e-4, rtol=1e-4), "mismatch in fallback path"

    print("KERNEL_OK")
</pallas_src>

<mosaic_0001>
module attributes {stable_mosaic.version = 11 : i64} {
  func.func @_coeff_refine_kernel(%arg0: i32, %arg1: memref<64x256xf32, #tpu.memory_space<vmem>>, %arg2: memref<256x40xf32, #tpu.memory_space<vmem>>, %arg3: memref<1x40xf32, #tpu.memory_space<vmem>>, %arg4: memref<64x40xf32, #tpu.memory_space<vmem>>) attributes {dimension_semantics = [#tpu.dimension_semantics<parallel>], iteration_bounds = array<i64: 4>, scalar_prefetch = 0 : i64, scratch_operands = 0 : i64, tpu.core_type = #tpu.core_type<tc>, window_params = [{transform_indices = @transform_0, window_bounds = array<i64: 64, 256>}, {pipeline_mode = #tpu.pipeline_mode<synchronous>, transform_indices = @transform_1, window_bounds = array<i64: 256, 40>}, {pipeline_mode = #tpu.pipeline_mode<synchronous>, transform_indices = @transform_2, window_bounds = array<i64: 1, 40>}, {transform_indices = @transform_3, window_bounds = array<i64: 64, 40>}]} {
    %c0 = arith.constant 0 : index
    %c0_0 = arith.constant 0 : index
    %0 = vector.load %arg1[%c0, %c0_0] : memref<64x256xf32, #tpu.memory_space<vmem>>, vector<64x256xf32>
    %c0_1 = arith.constant 0 : index
    %c0_2 = arith.constant 0 : index
    %1 = vector.load %arg2[%c0_1, %c0_2] : memref<256x40xf32, #tpu.memory_space<vmem>>, vector<256x40xf32>
    %cst = arith.constant dense<0.000000e+00> : vector<64x40xf32>
    %2 = tpu.matmul %0, %1, %cst {dimension_numbers = #tpu.dot_dimension_numbers<[1], [0], [0], [1], [0, 0, 1, 1], [], []>} : vector<64x256xf32>, vector<256x40xf32>, vector<64x40xf32> -> vector<64x40xf32>
    %c0_3 = arith.constant 0 : index
    %c0_4 = arith.constant 0 : index
    %3 = vector.load %arg3[%c0_3, %c0_4] : memref<1x40xf32, #tpu.memory_space<vmem>>, vector<1x40xf32>
    %4 = vector.broadcast %3 : vector<1x40xf32> to vector<64x40xf32>
    %5 = arith.addf %2, %4 : vector<64x40xf32>
    %c0_5 = arith.constant 0 : index
    %c0_6 = arith.constant 0 : index
    %6 = vector.load %arg4[%c0_5, %c0_6] : memref<64x40xf32, #tpu.memory_space<vmem>>, vector<64x40xf32>
    tpu.vector_store %arg4[%c0_5, %c0_6], %5 {strides = array<i32>} : memref<64x40xf32, #tpu.memory_space<vmem>>, vector<64x40xf32>,
    return
  }
  func.func @transform_0(%arg0: i32) -> (i32, i32) {
    %c0_i32 = arith.constant 0 : i32
    %c0_i32_0 = arith.constant 0 : i32
    return %arg0, %c0_i32 : i32, i32
  }
  func.func @transform_1(%arg0: i32) -> (i32, i32) {
    %c0_i32 = arith.constant 0 : i32
    %c0_i32_0 = arith.constant 0 : i32
    %c0_i32_1 = arith.constant 0 : i32
    return %c0_i32, %c0_i32_0 : i32, i32
  }
  func.func @transform_2(%arg0: i32) -> (i32, i32) {
    %c0_i32 = arith.constant 0 : i32
    %c0_i32_0 = arith.constant 0 : i32
    %c0_i32_1 = arith.constant 0 : i32
    return %c0_i32, %c0_i32_0 : i32, i32
  }
  func.func @transform_3(%arg0: i32) -> (i32, i32) {
    %c0_i32 = arith.constant 0 : i32
    %c0_i32_0 = arith.constant 0 : i32
    return %arg0, %c0_i32 : i32, i32
  }
}

</mosaic_0001>

<bundles_post_ra>
// kernel: tpu_custom_call.1
= control target key start
LH: loop header
LB: loop body
LE: loop exit
PB: predicated region body
PF: predicated region fallthrough
CT: control target
= control target key end

     0   :  { %8 = vsyncpa [#allocation3], 0  ;;  %s810_s0 = inlined_call_operand.hbm [shape: f32[256,256], index: 0, kind: input, shape index: {}]   ;;  %s811_s1 = inlined_call_operand.vmem [shape: f32[256,40], index: 1, kind: input, shape index: {}]   ;;  %s812_s2 = inlined_call_operand.vmem [shape: f32[1,40], index: 2, kind: input, shape index: {}]   ;;  %s813_s3 = inlined_call_operand.vmem [shape: f32[256,40], index: 3, kind: output, shape index: {}]  }
   0x1   :  { %10 = vsyncpa [#allocation3 + $0x1], 0  ;;  %s584_s12 = smov 0   ;;  %s586_s13 = smov 0  }
   0x2   :  { %s588_s14 = smov 0   ;;  %s590_s15 = smov 0  }
   0x3 LB: > { %s406_s16 = sadd.s32 4294967295, %s560_s15   ;;  %s604_s17 = sadd.s32 1, %s560_s15   ;;  %s560_s15 = sphi %s590_s15, %s820_s15   ;;  %s556_s14 = sphi %s588_s14, %s819_s14   ;;  %s552_s13 = sphi %s586_s13, %s818_s13   ;;  %s548_s12 = sphi %s584_s12, %s817_s12  }
   0x4   : > { %s20_s18 = ssub.s32 %s560_s15, %s604_s17  ;;  %s23_s19 = sadd.s32 1, %s556_s14 }
   0x5   : > { %p21_p0 = scmp.eq.s32.totalorder %s20_s18, 0  ;;  %p30_p1 = scmp.ne.s32.totalorder %s556_s14, %s552_s13 }
   0x6   : > { %p31_p2 = scmp.eq.s32.totalorder %s560_s15, 0  ;;  %p36_p3 = scmp.ne.s32.totalorder %s552_s13, %s548_s12 }
   0x7   : > { %s614_s20 = scalar_select %p21_p0, %s556_s14, %s23_s19  }
   0x8   : > { %p616_p4 = por %p31_p2, %p30_p1  ;;  %p37_p5 = scmp.eq.s32.totalorder %s406_s16, 0 }
   0x9   : > { %p460_p6 = scmp.lt.s32.totalorder %s560_s15, 4  ;;  %s134_s23 = sand.u32 1, %s556_s14  }
   0xa   : > { %p623_p7 = por %p37_p5, %p36_p3  ;;  %s410_s24 = sshll.u32 %s134_s23, 7 }
   0xb   : > { %s421_s25 = sshll.u32 %s560_s15, 7  ;;  %s138_s29 = scalar_lea.vmem [#allocation2], %s410_s24 }
   0xc   : > { %s144_s28 = scalar_lea.hbm %s810_s0, %s421_s25  ;;  %s147_s30 = sshll.u32 %s138_s29, 4  ;;  %s148_s30 = int_to_ptr.vmem [resolvable:$true] %s147_s30 }
   0xd   : > { %s145_s4 = sshll.u32 %s144_s28, 4  ;;  %p634_p8 = pnand %p460_p6, %p616_p4  ;;  %s146_s4 = int_to_ptr.hbm [resolvable:$true] %s145_s4 }
   0xe   : > { %p414_p9 = scmp.ge.s32.totalorder %s560_s15, 1  ;;  %s135_s6 = scalar_lea.sflag [#allocation3], %s134_s23 }
   0xf   : > { %s496_s7 = sshra.s32 %s146_s4, 4  ;;  %p500_p11 = pneg %p634_p8  ;;  %s497_s7 = int_to_ptr.hbm [resolvable:$true] %s496_s7 }
  0x10   : > { %s498_s8 = scalar_lea.hbm %s497_s7, 128  ;;  %s503_s11 = scalar_lea.hbm %s810_s0, 512 }
  0x11   : > { %p499_p10 = scmp.ne.s32.totalorder %s497_s7, %s498_s8  ;;  %p504_p0 = scmp.lt.s32.totalorder %s497_s7, %s810_s0 }
  0x12   : > { %p505_p1 = scmp.lt.s32.totalorder %s503_s11, %s498_s8 }
  0x13   : > { %p501_p12 = pnand %p500_p11, %p499_p10 }
  0x14   : > { %p506_p2 = por %p505_p1, %p504_p0 }
  0x15   : > { %p502_p13 = pneg %p501_p12 }
  0x17   : > { %p507_p3 = pnand %p506_p2, %p502_p13 }
  0x19   : > { %510 = shalt.err (!%p507_p3)
}
  0x1a   : > { %s562_s19 = smov 256   ;;  %s563_s21 = smov 16  }
  0x1b   : > { %459 = dma.hbm_to_vmem [thread:$0]  (!%p634_p8), %s146_s4, 2048, %s148_s30, %s135_s6, %s562_s19, %s562_s19, %s563_s21  }
  0x1c   : > { %p155_p4 = scmp.lt.s32.totalorder %s560_s15, 5 }
  0x1e   : > { %p156_p5 = pnand %p414_p9, %p155_p4 }
  0x1f   : > { %s161_s23 = sand.u32 (!%p156_p5), 1, %s552_s13  }
  0x20   : > { %159 = sbr.rel (%p156_p5) target bundleno = 231 (0xe7), region = 32  ;;  %s415_s24 = sshll.u32 (!%p156_p5), %s161_s23, 7 }
  0x21   : > { %s162_s25 = scalar_lea.sflag (!%p156_p5), [#allocation3], %s161_s23  ;;  %s653_s26 = scalar_lea.vmem (!%p156_p5), [#allocation2], %s415_s24 }
  0x25   : > { %543 = dma.done.wait (%p623_p7), %s162_s25, 2048  }
  0x26   : > { %545 = vsyncadd (%p623_p7), %s162_s25, 4294965248  ;;  %v227_v0 = vld [vmem:[%s811_s1 + $0x78] sm:$0xff]  ;;  %v226_v1 = vld [vmem:[%s811_s1 + $0x70] sm:$0xff]  ;;  %s416_s4 = sshll.u32 %s406_s16, 3  ;;  %vm330_vm0 = vcmask 326656  }
  0x27   : > { %v243_v2 = vld [vmem:[%s811_s1 + $0xf8] sm:$0xff]  ;;  %422 = vmatpush.msra.mxu2 %v227_v0  ;;  %v242_v3 = vld [vmem:[%s811_s1 + $0xf0] sm:$0xff]  ;;  %v225_v4 = vld [vmem:[%s811_s1 + $0x68] sm:$0xff]  ;;  %248 = vmatpush.msra.mxu0 %v227_v0  ;;  %p191_p6 = scmp.lt.s32.totalorder %s416_s4, 31 }
  0x28   : > { %438 = vmatpush.msra.mxu3 %v243_v2  ;;  %v241_v5 = vld [vmem:[%s811_s1 + $0xe8] sm:$0xff]  ;;  %289 = vmatpush.msra.mxu1 %v243_v2  ;;  %v224_v6 = vld [vmem:[%s811_s1 + $0x60] sm:$0xff]  ;;  %v223_v8 = vld [vmem:[%s811_s1 + $0x58] sm:$0xff] }
  0x29   : > { %423 = vmatpush.msra.mxu2 %v226_v1  ;;  %249 = vmatpush.msra.mxu0 %v226_v1  ;;  %v240_v7 = vld [vmem:[%s811_s1 + $0xe0] sm:$0xff]  ;;  %v239_v9 = vld [vmem:[%s811_s1 + $0xd8] sm:$0xff]  ;;  %v222_v10 = vld [vmem:[%s811_s1 + $0x50] sm:$0xff]  ;;  %s822_s4 = smov (!%p191_p6, %s416_s4), 31 }
  0x2a   : > { %439 = vmatpush.msra.mxu3 %v242_v3  ;;  %290 = vmatpush.msra.mxu1 %v242_v3  ;;  %v238_v11 = vld [vmem:[%s811_s1 + $0xd0] sm:$0xff]  ;;  %v221_v12 = vld [vmem:[%s811_s1 + $0x48] sm:$0xff]  ;;  %v220_v14 = vld [vmem:[%s811_s1 + $0x40] sm:$0xff]  ;;  %s417_s7 = sshll.u32 %s822_s4, 3 }
  0x2b   : > { %424 = vmatpush.msra.mxu2 %v225_v4  ;;  %250 = vmatpush.msra.mxu0 %v225_v4  ;;  %v237_v13 = vld [vmem:[%s811_s1 + $0xc8] sm:$0xff]  ;;  %v236_v15 = vld [vmem:[%s811_s1 + $0xc0] sm:$0xff]  ;;  %v219_v16 = vld [vmem:[%s811_s1 + $0x38] sm:$0xff] }
  0x2c   : > { %440 = vmatpush.msra.mxu3 %v241_v5  ;;  %291 = vmatpush.msra.mxu1 %v241_v5  ;;  %v235_v17 = vld [vmem:[%s811_s1 + $0xb8] sm:$0xff]  ;;  %v218_v18 = vld [vmem:[%s811_s1 + $0x30] sm:$0xff]  ;;  %v217_v20 = vld [vmem:[%s811_s1 + $0x28] sm:$0xff] }
  0x2d   : > { %425 = vmatpush.msra.mxu2 %v224_v6  ;;  %251 = vmatpush.msra.mxu0 %v224_v6  ;;  %v234_v19 = vld [vmem:[%s811_s1 + $0xb0] sm:$0xff]  ;;  %v233_v21 = vld [vmem:[%s811_s1 + $0xa8] sm:$0xff]  ;;  %v216_v22 = vld [vmem:[%s811_s1 + $0x20] sm:$0xff] }
  0x2e   : > { %441 = vmatpush.msra.mxu3 %v240_v7  ;;  %292 = vmatpush.msra.mxu1 %v240_v7  ;;  %v232_v23 = vld [vmem:[%s811_s1 + $0xa0] sm:$0xff]  ;;  %v215_v24 = vld [vmem:[%s811_s1 + $0x18] sm:$0xff]  ;;  %v214_v26 = vld [vmem:[%s811_s1 + $0x10] sm:$0xff] }
  0x2f   : > { %426 = vmatpush.msra.mxu2 %v223_v8  ;;  %252 = vmatpush.msra.mxu0 %v223_v8  ;;  %v231_v25 = vld [vmem:[%s811_s1 + $0x98] sm:$0xff]  ;;  %v230_v27 = vld [vmem:[%s811_s1 + $0x90] sm:$0xff]  ;;  %v213_v28 = vld [vmem:[%s811_s1 + $0x8] sm:$0xff] }
  0x30   : > { %442 = vmatpush.msra.mxu3 %v239_v9  ;;  %293 = vmatpush.msra.mxu1 %v239_v9  ;;  %v229_v29 = vld [vmem:[%s811_s1 + $0x88] sm:$0xff]  ;;  %v212_v30 = vld [vmem:[%s811_s1] sm:$0xff]  ;;  %v206_v36 = vld [vmem:[%s653_s26 + $0x50] sm:$0xff] }
  0x31   : > { %427 = vmatpush.msra.mxu2 %v222_v10  ;;  %253 = vmatpush.msra.mxu0 %v222_v10  ;;  %v228_v31 = vld [vmem:[%s811_s1 + $0x80] sm:$0xff]  ;;  %v205_v33 = vld [vmem:[%s653_s26 + $0x48] sm:$0xff]  ;;  %v207_v37 = vld [vmem:[%s653_s26 + $0x58] sm:$0xff] }
  0x32   : > { %443 = vmatpush.msra.mxu3 %v238_v11  ;;  %294 = vmatpush.msra.mxu1 %v238_v11  ;;  %v204_v32 = vld [vmem:[%s653_s26 + $0x40] sm:$0xff]  ;;  %v197_v35 = vld [vmem:[%s653_s26 + $0x8] sm:$0xff]  ;;  %v198_v38 = vld [vmem:[%s653_s26 + $0x10] sm:$0xff] }
  0x33   : > { %428 = vmatpush.msra.mxu2 %v221_v12  ;;  %254 = vmatpush.msra.mxu0 %v221_v12  ;;  %v196_v34 = vld [vmem:[%s653_s26] sm:$0xff]  ;;  %v199_v39 = vld [vmem:[%s653_s26 + $0x18] sm:$0xff]  ;;  %v209_v41 = vld [vmem:[%s653_s26 + $0x68] sm:$0xff] }
  0x34   : > { %444 = vmatpush.msra.mxu3 %v237_v13  ;;  %295 = vmatpush.msra.mxu1 %v237_v13  ;;  %v208_v40 = vld [vmem:[%s653_s26 + $0x60] sm:$0xff]  ;;  %v201_v43 = vld [vmem:[%s653_s26 + $0x28] sm:$0xff]  ;;  %v210_v44 = vld [vmem:[%s653_s26 + $0x70] sm:$0xff] }
  0x35   : > { %429 = vmatpush.msra.mxu2 %v220_v14  ;;  %255 = vmatpush.msra.mxu0 %v220_v14  ;;  %v200_v42 = vld [vmem:[%s653_s26 + $0x20] sm:$0xff]  ;;  %v211_v45 = vld [vmem:[%s653_s26 + $0x78] sm:$0xff]  ;;  %v202_v46 = vld [vmem:[%s653_s26 + $0x30] sm:$0xff] }
  0x36   : > { %445 = vmatpush.msra.mxu3 %v236_v15  ;;  %296 = vmatpush.msra.mxu1 %v236_v15  ;;  %v203_v47 = vld [vmem:[%s653_s26 + $0x38] sm:$0xff]  ;;  %v495_v48 = vld [vmem:[%s812_s2] ss:$0 sm:$0xff]  ;;  %s779_s26 = scalar_lea.vmem %s813_s3, %s417_s7 }
  0x37   : > { %430 = vmatpush.msra.mxu2 %v219_v16  ;;  %256 = vmatpush.msra.mxu0 %v219_v16 }
  0x38   : > { %446 = vmatpush.msra.mxu3 %v235_v17  ;;  %297 = vmatpush.msra.mxu1 %v235_v17 }
  0x39   : > { %431 = vmatpush.msra.mxu2 %v218_v18  ;;  %257 = vmatpush.msra.mxu0 %v218_v18 }
  0x3a   : > { %447 = vmatpush.msra.mxu3 %v234_v19  ;;  %298 = vmatpush.msra.mxu1 %v234_v19 }
  0x3b   : > { %432 = vmatpush.msra.mxu2 %v217_v20  ;;  %258 = vmatpush.msra.mxu0 %v217_v20 }
  0x3c   : > { %448 = vmatpush.msra.mxu3 %v233_v21  ;;  %299 = vmatpush.msra.mxu1 %v233_v21 }
  0x3d   : > { %433 = vmatpush.msra.mxu2 %v216_v22  ;;  %259 = vmatpush.msra.mxu0 %v216_v22 }
  0x3e   : > { %449 = vmatpush.msra.mxu3 %v232_v23  ;;  %300 = vmatpush.msra.mxu1 %v232_v23 }
  0x3f   : > { %434 = vmatpush.msra.mxu2 %v215_v24  ;;  %260 = vmatpush.msra.mxu0 %v215_v24 }
  0x40   : > { %450 = vmatpush.msra.mxu3 %v231_v25  ;;  %301 = vmatpush.msra.mxu1 %v231_v25 }
  0x41   : > { %435 = vmatpush.msra.mxu2 %v214_v26  ;;  %261 = vmatpush.msra.mxu0 %v214_v26 }
  0x42   : > { %451 = vmatpush.msra.mxu3 %v230_v27  ;;  %302 = vmatpush.msra.mxu1 %v230_v27 }
  0x43   : > { %436 = vmatpush.msra.mxu2 %v213_v28  ;;  %262 = vmatpush.msra.mxu0 %v213_v28 }
  0x44   : > { %452 = vmatpush.msra.mxu3 %v229_v29  ;;  %303 = vmatpush.msra.mxu1 %v229_v29 }
  0x45   : > { %437 = vmatpush.msra.mxu2 %v212_v30  ;;  %263 = vmatpush.msra.mxu0 %v212_v30 }
  0x46   : > { %453 = vmatpush.msra.mxu3 %v228_v31  ;;  %276 = vmatmul.f32.vlgmr.msra.gmra.mxu2 %v204_v32 }
  0x47   : > { %317 = vmatmul.f32.vlgmr.msra.gmra.mxu3 %v205_v33  ;;  %304 = vmatpush.msra.mxu1 %v228_v31 }
  0x48   : > { %264 = vmatmul.f32.vlgmr.msra.gmra.mxu0 %v196_v34  ;;  %305 = vmatmul.f32.vlgmr.msra.gmra.mxu1 %v197_v35 }
  0x4e   : > { %279 = vmatmul.f32.gmra.mxu2 %v206_v36 }
  0x4f   : > { %320 = vmatmul.f32.gmra.mxu3 %v207_v37 }
  0x50   : > { %267 = vmatmul.f32.gmra.mxu0 %v198_v38  ;;  %308 = vmatmul.f32.gmra.mxu1 %v199_v39 }
  0x56   : > { %282 = vmatmul.f32.gmra.mxu2 %v208_v40 }
  0x57   : > { %323 = vmatmul.f32.gmra.mxu3 %v209_v41 }
  0x58   : > { %270 = vmatmul.f32.gmra.mxu0 %v200_v42  ;;  %311 = vmatmul.f32.gmra.mxu1 %v201_v43 }
  0x5e   : > { %285 = vmatmul.f32.gmra.mxu2 %v210_v44 }
  0x5f   : > { %326 = vmatmul.f32.gmra.mxu3 %v211_v45 }
  0x60   : > { %273 = vmatmul.f32.gmra.mxu0 %v202_v46  ;;  %314 = vmatmul.f32.gmra.mxu1 %v203_v47 }
  0xc5   : > { %v265_v49 = vpop.f32.mrf.mxu0  ;;  %v306_v50 = vpop.f32.mrf.mxu1 }
  0xc6   : > { %v266_v51 = vadd.f32 %v495_v48, %v265_v49 }
  0xc8   : > { %v307_v52 = vadd.f32 %v306_v50, %v266_v51 }
  0xc9   : > { %v277_v53 = vpop.f32.mrf.mxu2 }
  0xca   : > { %v318_v54 = vpop.f32.mrf.mxu3  ;;  %v278_v55 = vadd.f32 %v495_v48, %v277_v53  ;;  %331 = vst.msk [vmem:[%s779_s26] sm:$0xff] %vm330_vm0, %v307_v52 }
  0xcc   : > { %v319_v56 = vadd.f32 %v318_v54, %v278_v55 }
  0xcd   : > { %v268_v57 = vpop.f32.mrf.mxu0  ;;  %v309_v58 = vpop.f32.mrf.mxu1 }
  0xce   : > { %335 = vst.msk [vmem:[%s779_s26 + $0x20] sm:$0xff] %vm330_vm0, %v319_v56  ;;  %v269_v59 = vadd.f32 %v495_v48, %v268_v57 }
  0xd0   : > { %v310_v60 = vadd.f32 %v309_v58, %v269_v59 }
  0xd1   : > { %v280_v61 = vpop.f32.mrf.mxu2 }
  0xd2   : > { %v321_v62 = vpop.f32.mrf.mxu3  ;;  %v281_v63 = vadd.f32 %v495_v48, %v280_v61  ;;  %332 = vst.msk [vmem:[%s779_s26 + $0x8] sm:$0xff] %vm330_vm0, %v310_v60 }
  0xd4   : > { %v322_v0 = vadd.f32 %v321_v62, %v281_v63 }
  0xd5   : > { %v271_v1 = vpop.f32.mrf.mxu0  ;;  %v312_v2 = vpop.f32.mrf.mxu1 }
  0xd6   : > { %336 = vst.msk [vmem:[%s779_s26 + $0x28] sm:$0xff] %vm330_vm0, %v322_v0  ;;  %v272_v3 = vadd.f32 %v495_v48, %v271_v1 }
  0xd8   : > { %v313_v4 = vadd.f32 %v312_v2, %v272_v3 }
  0xd9   : > { %v283_v5 = vpop.f32.mrf.mxu2 }
  0xda   : > { %v324_v6 = vpop.f32.mrf.mxu3  ;;  %v284_v7 = vadd.f32 %v495_v48, %v283_v5  ;;  %333 = vst.msk [vmem:[%s779_s26 + $0x10] sm:$0xff] %vm330_vm0, %v313_v4 }
  0xdc   : > { %v325_v8 = vadd.f32 %v324_v6, %v284_v7 }
  0xdd   : > { %v274_v9 = vpop.f32.mrf.mxu0  ;;  %v315_v10 = vpop.f32.mrf.mxu1 }
  0xde   : > { %337 = vst.msk [vmem:[%s779_s26 + $0x30] sm:$0xff] %vm330_vm0, %v325_v8  ;;  %v275_v11 = vadd.f32 %v495_v48, %v274_v9 }
  0xe0   : > { %v316_v12 = vadd.f32 %v315_v10, %v275_v11 }
  0xe1   : > { %v286_v13 = vpop.f32.mrf.mxu2 }
  0xe2   : > { %v327_v14 = vpop.f32.mrf.mxu3  ;;  %v287_v15 = vadd.f32 %v495_v48, %v286_v13  ;;  %334 = vst.msk [vmem:[%s779_s26 + $0x18] sm:$0xff] %vm330_vm0, %v316_v12 }
  0xe4   : > { %v328_v16 = vadd.f32 %v327_v14, %v287_v15 }
  0xe6   : > { %338 = vst.msk [vmem:[%s779_s26 + $0x38] sm:$0xff] %vm330_vm0, %v328_v16 }
  0xe7 PF: > { %p13_p7 = scmp.ge.s32.totalorder %s604_s17, 6   ;;  %s817_s12 = smov %s552_s13 }
  0xe8   : > { %s818_s13 = smov %s556_s14  ;;  %s819_s14 = smov %s614_s20 }
  0xe9   : > { %s820_s15 = smov %s604_s17  ;;  %15 = sbr.rel (!%p13_p7) target bundleno = 3 (0x3), region = 72 }
  0xee   :  { %361 = vsyncpa [#allocation3], 1 }
  0xef   :  { %363 = vsyncpa [#allocation3 + $0x1], 1 }

</bundles_post_ra>
